<compile_context>
chip_gen: v5e
topology: v5e:2x2
jax: 0.10.0
libtpu: 0.0.40
codegen_flags: <defaults>
</compile_context>

<pallas_src>
import functools

import jax
import jax.numpy as jnp
from jax import lax
from jax.experimental import pallas as pl
from jax.experimental.pallas import tpu as pltpu

LANES = 128
SUBLANES = 8


def _lognorm_kernel(p_ref, a_ref, o_ref, *, tol, total_rows, block_rows, steps):
    c = pl.program_id(0)   # parallel (core) axis
    j = pl.program_id(1)   # reduction axis

    @pl.when(j == 0)
    def _init():
        o_ref[...] = jnp.zeros_like(o_ref)

    # Logical block handled by this step. For the trailing core on ragged
    # splits this may point past the real data; the index_map clamps the DMA
    # in-bounds and the row mask below zeroes its contribution.
    blk = c * steps + j
    row0 = blk * block_rows
    local_row = lax.broadcasted_iota(jnp.int32, (block_rows, LANES), 0)
    valid = (row0 + local_row) < total_rows

    # Mask invalid rows *before* the logs so no garbage/NaN is ever created.
    p = jnp.where(valid, p_ref[...].astype(jnp.float32), 1.0)
    a = jnp.where(valid, a_ref[...].astype(jnp.float32), 1.0)
    d = jnp.log(jnp.maximum(p, 0.0) + tol) - jnp.log(jnp.maximum(a, 0.0) + tol)
    dsq = d * d

    # VPU-only partial reduction: fold the block's sublane groups into one
    # (8, 128) vreg and accumulate into the resident output block. No per-step
    # cross-lane reduce, no per-step SMEM scalar read-modify-write.
    part = dsq.reshape(block_rows // SUBLANES, SUBLANES, LANES).sum(axis=0)
    o_ref[...] += part[None, :, :]


def log_norm_loss(pred, actual, tol=1e-10, block_rows=2048, n_cores=2):
    assert pred.shape == actual.shape
    n = pred.size
    rows = pl.cdiv(n, LANES)
    n_pad = rows * LANES

    def _prep(x):
        x = jnp.ravel(x)  # no wrapper-side astype; kernel casts per block
        if n_pad != n:
            # zero padding contributes exactly 0: log(relu(0)+tol) cancels.
            x = jnp.pad(x, (0, n_pad - n))
        return x.reshape(rows, LANES)

    p2 = _prep(pred)
    a2 = _prep(actual)

    # ~1 MiB f32 blocks (2 inputs x 2 buffers = 4 MiB VMEM: fits every
    # generation's default scoped-VMEM limit). Cap for small inputs.
    block_rows = min(block_rows, pl.cdiv(rows, SUBLANES) * SUBLANES)
    assert block_rows % SUBLANES == 0

    total_blocks = pl.cdiv(rows, block_rows)
    steps = pl.cdiv(total_blocks, n_cores)

    def _in_map(c, j):
        # Clamp so the DMA for "overflow" steps of the last core stays
        # in-bounds (their contribution is masked to 0 inside the kernel).
        return (jnp.minimum(c * steps + j, total_blocks - 1), 0)

    kernel = functools.partial(
        _lognorm_kernel,
        tol=float(tol),
        total_rows=rows,
        block_rows=block_rows,
        steps=steps,
    )

    partials = pl.pallas_call(
        kernel,
        out_shape=jax.ShapeDtypeStruct((n_cores, SUBLANES, LANES), jnp.float32),
        grid_spec=pltpu.PrefetchScalarGridSpec(
            num_scalar_prefetch=0,
            grid=(n_cores, steps),
            in_specs=[
                pl.BlockSpec((block_rows, LANES), _in_map),
                pl.BlockSpec((block_rows, LANES), _in_map),
            ],
            out_specs=pl.BlockSpec((1, SUBLANES, LANES), lambda c, j: (c, 0, 0)),
        ),
        compiler_params=pltpu.CompilerParams(
            dimension_semantics=("parallel", "arbitrary")
        ),
    )(p2, a2)

    # Single cross-lane reduce + sqrt over n_cores*8*128 floats (tiny).
    return jnp.sqrt(jnp.sum(partials))


def _reference(pred, actual, tol=1e-10):
    d = jnp.log(jnp.maximum(pred, 0.0) + tol) - jnp.log(jnp.maximum(actual, 0.0) + tol)
    return jnp.sqrt(jnp.sum(d * d))


if __name__ == "__main__":
    key = jax.random.PRNGKey(0)
    k1, k2 = jax.random.split(key)
    # Small NCHW-like inputs (op is elementwise + full reduce, any shape works).
    pred = jax.random.uniform(k1, (2, 4, 16, 16), dtype=jnp.float32)
    actual = jax.random.uniform(k2, (2, 4, 16, 16), dtype=jnp.float32)

    out = log_norm_loss(pred, actual)
    jax.block_until_ready(out)

    ref = _reference(pred, actual)
    assert jnp.allclose(out, ref, rtol=1e-5, atol=1e-5), (out, ref)
    print("KERNEL_OK")
</pallas_src>

<mosaic_0001>
module attributes {stable_mosaic.version = 11 : i64} {
  func.func @_lognorm_kernel(%arg0: i32, %arg1: i32, %arg2: memref<16x128xf32, #tpu.memory_space<vmem>>, %arg3: memref<16x128xf32, #tpu.memory_space<vmem>>, %arg4: memref<1x8x128xf32, #tpu.memory_space<vmem>>) attributes {dimension_semantics = [#tpu.dimension_semantics<parallel>, #tpu.dimension_semantics<arbitrary>], iteration_bounds = array<i64: 2, 1>, scalar_prefetch = 0 : i64, scratch_operands = 0 : i64, tpu.core_type = #tpu.core_type<tc>, window_params = [{transform_indices = @transform_0, window_bounds = array<i64: 16, 128>}, {transform_indices = @transform_1, window_bounds = array<i64: 16, 128>}, {transform_indices = @transform_2, window_bounds = array<i64: 1, 8, 128>}]} {
    %c0_i32 = arith.constant 0 : i32
    %0 = arith.cmpi eq, %arg1, %c0_i32 : i32
    %1 = arith.extui %0 : i1 to i32
    %c0_i32_0 = arith.constant 0 : i32
    %2 = arith.cmpi ne, %1, %c0_i32_0 : i32
    scf.if %2 {
      %cst_17 = arith.constant 0.000000e+00 : f32
      %35 = vector.broadcast %cst_17 : f32 to vector<1x8x128xf32>
      %c0_18 = arith.constant 0 : index
      %c0_19 = arith.constant 0 : index
      %c0_20 = arith.constant 0 : index
      %36 = vector.load %arg4[%c0_18, %c0_19, %c0_20] : memref<1x8x128xf32, #tpu.memory_space<vmem>>, vector<1x8x128xf32>
      tpu.vector_store %arg4[%c0_18, %c0_19, %c0_20], %35 {strides = array<i32>} : memref<1x8x128xf32, #tpu.memory_space<vmem>>, vector<1x8x128xf32>,
    } else {
    }
    %c1_i32 = arith.constant 1 : i32
    %3 = arith.muli %arg0, %c1_i32 : i32
    %4 = arith.addi %3, %arg1 : i32
    %c16_i32 = arith.constant 16 : i32
    %5 = arith.muli %4, %c16_i32 : i32
    %6 = tpu.iota {dimensions = array<i32: 0>} : vector<16x128xi32>
    %7 = vector.broadcast %5 : i32 to vector<16x128xi32>
    %8 = arith.addi %7, %6 : vector<16x128xi32>
    %c16_i32_1 = arith.constant 16 : i32
    %9 = vector.broadcast %c16_i32_1 : i32 to vector<16x128xi32>
    %10 = arith.cmpi slt, %8, %9 : vector<16x128xi32>
    %c0 = arith.constant 0 : index
    %c0_2 = arith.constant 0 : index
    %11 = vector.load %arg2[%c0, %c0_2] : memref<16x128xf32, #tpu.memory_space<vmem>>, vector<16x128xf32>
    %cst = arith.constant 1.000000e+00 : f32
    %12 = vector.broadcast %cst : f32 to vector<16x128xf32>
    %13 = arith.select %10, %11, %12 : vector<16x128xi1>, vector<16x128xf32>
    %c0_3 = arith.constant 0 : index
    %c0_4 = arith.constant 0 : index
    %14 = vector.load %arg3[%c0_3, %c0_4] : memref<16x128xf32, #tpu.memory_space<vmem>>, vector<16x128xf32>
    %cst_5 = arith.constant 1.000000e+00 : f32
    %15 = vector.broadcast %cst_5 : f32 to vector<16x128xf32>
    %16 = arith.select %10, %14, %15 : vector<16x128xi1>, vector<16x128xf32>
    %cst_6 = arith.constant 0.000000e+00 : f32
    %17 = vector.broadcast %cst_6 : f32 to vector<16x128xf32>
    %18 = arith.maximumf %13, %17 : vector<16x128xf32>
    %cst_7 = arith.constant 1.000000e-10 : f32
    %19 = vector.broadcast %cst_7 : f32 to vector<16x128xf32>
    %20 = arith.addf %18, %19 : vector<16x128xf32>
    %21 = math.log %20 : vector<16x128xf32>
    %cst_8 = arith.constant 0.000000e+00 : f32
    %22 = vector.broadcast %cst_8 : f32 to vector<16x128xf32>
    %23 = arith.maximumf %16, %22 : vector<16x128xf32>
    %cst_9 = arith.constant 1.000000e-10 : f32
    %24 = vector.broadcast %cst_9 : f32 to vector<16x128xf32>
    %25 = arith.addf %23, %24 : vector<16x128xf32>
    %26 = math.log %25 : vector<16x128xf32>
    %27 = arith.subf %21, %26 : vector<16x128xf32>
    %28 = arith.mulf %27, %27 : vector<16x128xf32>
    %29 = vector.shape_cast %28 : vector<16x128xf32> to vector<2x8x128xf32>
    %cst_10 = arith.constant dense<0.000000e+00> : vector<8x128xf32>
    %30 = vector.multi_reduction <add>, %29, %cst_10 [0] : vector<2x8x128xf32> to vector<8x128xf32>
    %c0_11 = arith.constant 0 : index
    %c0_12 = arith.constant 0 : index
    %c0_13 = arith.constant 0 : index
    %31 = vector.load %arg4[%c0_11, %c0_12, %c0_13] : memref<1x8x128xf32, #tpu.memory_space<vmem>>, vector<1x8x128xf32>
    %32 = vector.shape_cast %30 : vector<8x128xf32> to vector<1x8x128xf32>
    %33 = arith.addf %31, %32 : vector<1x8x128xf32>
    %c0_14 = arith.constant 0 : index
    %c0_15 = arith.constant 0 : index
    %c0_16 = arith.constant 0 : index
    %34 = vector.load %arg4[%c0_14, %c0_15, %c0_16] : memref<1x8x128xf32, #tpu.memory_space<vmem>>, vector<1x8x128xf32>
    tpu.vector_store %arg4[%c0_14, %c0_15, %c0_16], %33 {strides = array<i32>} : memref<1x8x128xf32, #tpu.memory_space<vmem>>, vector<1x8x128xf32>,
    return
  }
  func.func @transform_0(%arg0: i32, %arg1: i32) -> (i32, i32) {
    %c1_i32 = arith.constant 1 : i32
    %0 = arith.muli %arg0, %c1_i32 : i32
    %1 = arith.addi %0, %arg1 : i32
    %c0_i32 = arith.constant 0 : i32
    %2 = arith.minsi %1, %c0_i32 : i32
    %c0_i32_0 = arith.constant 0 : i32
    %c0_i32_1 = arith.constant 0 : i32
    return %2, %c0_i32_0 : i32, i32
  }
  func.func @transform_1(%arg0: i32, %arg1: i32) -> (i32, i32) {
    %c1_i32 = arith.constant 1 : i32
    %0 = arith.muli %arg0, %c1_i32 : i32
    %1 = arith.addi %0, %arg1 : i32
    %c0_i32 = arith.constant 0 : i32
    %2 = arith.minsi %1, %c0_i32 : i32
    %c0_i32_0 = arith.constant 0 : i32
    %c0_i32_1 = arith.constant 0 : i32
    return %2, %c0_i32_0 : i32, i32
  }
  func.func @transform_2(%arg0: i32, %arg1: i32) -> (i32, i32, i32) {
    %c0_i32 = arith.constant 0 : i32
    %c0_i32_0 = arith.constant 0 : i32
    %c0_i32_1 = arith.constant 0 : i32
    return %arg0, %c0_i32, %c0_i32_0 : i32, i32, i32
  }
}

</mosaic_0001>

<bundles_post_ra>
// kernel: tpu_custom_call.1
= control target key start
LH: loop header
LB: loop body
LE: loop exit
PB: predicated region body
PF: predicated region fallthrough
CT: control target
= control target key end

     0   :  { %7 = vsyncpa [#allocation3], 0  ;;  %s888_s0 = inlined_call_operand.hbm [shape: f32[16,128], index: 0, kind: input, shape index: {}]   ;;  %s889_s1 = inlined_call_operand.hbm [shape: f32[16,128], index: 1, kind: input, shape index: {}]   ;;  %s890_s2 = inlined_call_operand.hbm [shape: f32[2,8,128], index: 2, kind: output, shape index: {}]  }
   0x1   :  { %9 = vsyncpa [#allocation3 + $0x1], 0 }
   0x2   :  { %10 = vsyncpa [#allocation6], 0 }
   0x3   :  { %12 = vsyncpa [#allocation6 + $0x1], 0 }
   0x4   :  { %13 = vsyncpa [#allocation4], 0 }
   0x5   :  { %15 = vsyncpa [#allocation4 + $0x1], 0  ;;  %s719_s9 = smov 0   ;;  %s721_s10 = smov 0  }
   0x6   :  { %s723_s11 = smov 0   ;;  %s725_s12 = smov 0  }
   0x7   :  { %s727_s13 = smov 0   ;;  %s729_s14 = smov 0  }
   0x8   :  { %s731_s15 = smov 0   ;;  %s733_s16 = smov 0  }
   0x9 LB: > { %s408_s17 = sadd.s32 4294967295, %s698_s16   ;;  %s409_s18 = sadd.s32 4294967294, %s698_s16   ;;  %s698_s16 = sphi %s733_s16, %s21_s16   ;;  %s694_s15 = sphi %s731_s15, %s902_s15   ;;  %s690_s14 = sphi %s729_s14, %s901_s14   ;;  %s686_s13 = sphi %s727_s13, %s878_s13   ;;  %s682_s12 = sphi %s725_s12, %s900_s12   ;;  %s678_s11 = sphi %s723_s11, %s899_s11   ;;  %s674_s10 = sphi %s721_s10, %s898_s10   ;;  %s670_s9 = sphi %s719_s9, %s897_s9  }
   0xa   : > { %s33_s19 = sadd.s32 1, %s694_s15  ;;  %p667_p1 = scmp.ne.s32.totalorder %s686_s13, 0 }
   0xb   : > { %p35_p0 = scmp.ge.s32.totalorder %s33_s19, 2  ;;  %p54_p2 = scmp.eq.s32.totalorder %s698_s16, 0 }
   0xc   : > { %p59_p3 = scmp.ne.s32.totalorder %s686_s13, %s682_s12  ;;  %p60_p5 = scmp.eq.s32.totalorder %s408_s17, 0 }
   0xd   : > { %s904_s19 = smov (%p35_p0, %s33_s19), 0  ;;  %p765_p4 = por %p667_p1, %p54_p2 }
   0xe   : > { %p769_p6 = por %p60_p5, %p59_p3  ;;  %s101_s22 = ssub.s32 %s694_s15, %s904_s19 }
   0xf   : > { %p102_p7 = scmp.eq.s32.totalorder %s101_s22, 0  ;;  %s104_s23 = sadd.s32 1, %s678_s11 }
  0x10   : > { %p114_p8 = scmp.ne.s32.totalorder %s678_s11, %s674_s10  ;;  %p115_p9 = scmp.eq.s32.totalorder %s408_s17, 1 }
  0x11   : > { %s777_s24 = scalar_select %p102_p7, %s678_s11, %s104_s23  }
  0x12   : > { %p120_p10 = scmp.ne.s32.totalorder %s674_s10, %s670_s9  ;;  %p121_p11 = scmp.eq.s32.totalorder %s409_s18, 1 }
  0x13   : > { %p783_p12 = por %p115_p9, %p114_p8  ;;  %p411_p13 = scmp.ge.s32.totalorder %s698_s16, 2 }
  0x14   : > { %p788_p0 = por %p121_p11, %p120_p10  ;;  %p446_p1 = scmp.lt.s32.totalorder %s698_s16, 2 }
  0x15   : > { %s154_s29 = sshll.u32 %s888_s0, 4  ;;  %s700_s30 = smov [#allocation2]   ;;  %s155_s29 = int_to_ptr.hbm [resolvable:$true] %s154_s29 }
  0x16   : > { %s156_s3 = sshll.u32 %s700_s30, 4  ;;  %p798_p2 = pnand %p446_p1, %p765_p4  ;;  %s157_s3 = int_to_ptr.vmem [resolvable:$true] %s156_s3 }
  0x17   : > { %p418_p3 = scmp.ge.s32.totalorder %s698_s16, 1  ;;  %p189_p5 = scmp.lt.s32.totalorder %s698_s16, 3 }
  0x18   : > { %s531_s5 = sshra.s32 %s155_s29, 4  ;;  %p535_p8 = pneg %p798_p2  ;;  %s532_s5 = int_to_ptr.hbm [resolvable:$true] %s531_s5 }
  0x19   : > { %s533_s6 = scalar_lea.hbm %s532_s5, 16  ;;  %s538_s12 = scalar_lea.hbm %s888_s0, 16 }
  0x1a   : > { %p534_p7 = scmp.ne.s32.totalorder %s532_s5, %s533_s6  ;;  %p540_p4 = scmp.lt.s32.totalorder %s538_s12, %s533_s6 }
  0x1c   : > { %p536_p9 = pnand %p535_p8, %p534_p7 }
  0x1e   : > { %p537_p10 = pneg %p536_p9 }
  0x20   : > { %p542_p11 = pnand %p540_p4, %p537_p10 }
  0x22   : > { %545 = shalt.err (!%p542_p11)
}
  0x23   : > { %s701_s17 = smov 128   ;;  %s702_s18 = smov 8  }
  0x24   : > { %438 = dma.hbm_to_vmem [thread:$0]  (!%p798_p2), %s155_s29, 256, %s157_s3, [#allocation3], %s701_s17, %s701_s17, %s702_s18  }
  0x25   : > { %p818_p1 = pnand %p418_p3, %p189_p5  ;;  %s179_s27 = sshll.u32 %s889_s1, 4  ;;  %s180_s27 = int_to_ptr.hbm [resolvable:$true] %s179_s27 }
  0x26   : > { %s703_s28 = smov [#allocation5]   ;;  %s561_s5 = sshra.s32 %s180_s27, 4  ;;  %s562_s5 = int_to_ptr.hbm [resolvable:$true] %s561_s5 }
  0x27   : > { %s181_s30 = sshll.u32 %s703_s28, 4  ;;  %s563_s6 = scalar_lea.hbm %s562_s5, 16  ;;  %s182_s30 = int_to_ptr.vmem [resolvable:$true] %s181_s30 }
  0x28   : > { %p564_p7 = scmp.ne.s32.totalorder %s562_s5, %s563_s6  ;;  %s568_s7 = scalar_lea.hbm %s889_s1, 16 }
  0x29   : > { %p570_p3 = scmp.lt.s32.totalorder %s568_s7, %s563_s6 }
  0x2a   : > { %p566_p9 = pnand %p564_p7, %p535_p8 }
  0x2c   : > { %p567_p10 = pneg %p566_p9 }
  0x2e   : > { %p572_p5 = pnand %p570_p3, %p567_p10 }
  0x30   : > { %575 = shalt.err (!%p572_p5)
}
  0x31   : > { %441 = dma.hbm_to_vmem [thread:$0]  (!%p798_p2), %s180_s27, 256, %s182_s30, [#allocation6], %s701_s17, %s701_s17, %s702_s18  }
  0x32   : > { %193 = sbr.rel (%p818_p1) target bundleno = 92 (0x5c), region = 28  ;;  %s195_s8 = sand.u32 (!%p818_p1), 1, %s686_s13  }
  0x33   : > { %s419_s12 = sshll.u32 (!%p818_p1), %s195_s8, 4  ;;  %s196_s22 = scalar_lea.sflag (!%p818_p1), [#allocation3], %s195_s8 }
  0x34   : > { %s199_s23 = scalar_lea.vmem (!%p818_p1), [#allocation2], %s419_s12 }
  0x37   : > { %656 = dma.done.wait (%p769_p6), %s196_s22, 256  }
  0x38   : > { %658 = vsyncadd (%p769_p6), %s196_s22, 4294967040  ;;  %s206_s28 = scalar_lea.sflag [#allocation6], %s195_s8  ;;  %s209_s5 = scalar_lea.vmem [#allocation5], %s419_s12 }
  0x39   : > { %660 = dma.done.wait (%p769_p6), %s206_s28, 256  }
  0x3a   : > { %662 = vsyncadd (%p769_p6), %s206_s28, 4294967040  ;;  %s422_s4 = sshll.u32 %s690_s14, 4  ;;  %v251_v0 = vlaneseq  ;;  %v259_v6 = vld [vmem:[%s199_s23] sm:$0xff]  ;;  %v260_v7 = vld [vmem:[%s199_s23 + $0x8] sm:$0xff]  ;;  %s233_s21 = sand.u32 1, %s674_s10  }
  0x3b   : > { %v254_v1 = vstv %s422_s4  ;;  %v263_v8 = vld [vmem:[%s209_s5] sm:$0xff]  ;;  %v264_v10 = vld [vmem:[%s209_s5 + $0x8] sm:$0xff]  ;;  %s421_s17 = sshll.u32 %s233_s21, 3  ;;  %s424_s18 = sshll.u32 %s690_s14, 3 }
  0x3c   : > { %v252_v2 = vshrl.u32 %v251_v0, 7  ;;  %s302_s30 = scalar_lea.hbm %s890_s2, %s424_s18  ;;  %s235_s6 = scalar_lea.vmem [#allocation7], %s421_s17 }
  0x3d   : > { %s304_s29 = sshll.u32 %s235_s6, 4  ;;  %s306_s3 = sshll.u32 %s302_s30, 4  ;;  %s305_s29 = int_to_ptr.vmem [resolvable:$true] %s304_s29  ;;  %s307_s3 = int_to_ptr.hbm [resolvable:$true] %s306_s3 }
  0x3e   : > { %v253_v3 = vadd.s32 8, %v252_v2  ;;  %v255_v4 = vadd.s32 %v254_v1, %v252_v2  ;;  %s292_s7 = scalar_lea.sflag [#allocation4], %s233_s21  ;;  %s605_s8 = sshra.s32 %s307_s3, 4  ;;  %s606_s8 = int_to_ptr.hbm [resolvable:$true] %s605_s8 }
  0x3f   : > { %s607_s14 = scalar_lea.hbm %s606_s8, 8  ;;  %s611_s23 = scalar_lea.hbm %s890_s2, 16 }
  0x40   : > { %v256_v5 = vadd.s32 %v254_v1, %v253_v3  ;;  %vm257_vm0 = vcmp.lt.s32.totalorder %v255_v4, 16  ;;  %p608_p6 = scmp.ne.s32.totalorder %s606_s8, %s607_s14  ;;  %p612_p4 = scmp.lt.s32.totalorder %s606_s8, %s890_s2 }
  0x41   : > { %v261_v9 = vsel %vm257_vm0, %v259_v6, 1.0  ;;  %v265_v11 = vsel %vm257_vm0, %v263_v8, 1.0  ;;  %p613_p11 = scmp.lt.s32.totalorder %s611_s23, %s607_s14 }
  0x42   : > { %vm258_vm1 = vcmp.lt.s32.totalorder %v256_v5, 16  ;;  %v267_v14 = vmax.f32 %v261_v9, 0.0  ;;  %v275_v15 = vmax.f32 %v265_v11, 0.0  ;;  %p609_p2 = pnand %p608_p6, %p783_p12 }
  0x43   : > { %v262_v12 = vsel %vm258_vm1, %v260_v7, 1.0  ;;  %v266_v13 = vsel %vm258_vm1, %v264_v10, 1.0  ;;  %p614_p1 = por %p613_p11, %p612_p4 }
  0x44   : > { %v268_v16 = vmax.f32 %v262_v12, 0.0  ;;  %v276_v17 = vmax.f32 %v266_v13, 0.0  ;;  %v269_v18 = vadd.f32 1e-10, %v267_v14  ;;  %v277_v19 = vadd.f32 1e-10, %v275_v15  ;;  %p610_p8 = pneg %p609_p2 }
  0x46   : > { %v270_v20 = vadd.f32 1e-10, %v268_v16  ;;  %v278_v21 = vadd.f32 1e-10, %v276_v17  ;;  %523 = vlog2.f32 %v269_v18  ;;  %p615_p7 = pnand %p614_p1, %p610_p8 }
  0x48   : > { %525 = vlog2.f32 %v270_v20 }
  0x49   : > { %527 = vlog2.f32 %v277_v19 }
  0x4a   : > { %529 = vlog2.f32 %v278_v21 }
  0x4c   : > { %v524_v22 = vpop.eup %523 }
  0x4d   : > { %v272_v24 = vmul.f32 0.6931472, %v524_v22 }
  0x4e   : > { %v526_v23 = vpop.eup %525 }
  0x4f   : > { %v528_v25 = vpop.eup %527  ;;  %v274_v26 = vmul.f32 0.6931472, %v526_v23 }
  0x50   : > { %v530_v27 = vpop.eup %529  ;;  %v280_v28 = vmul.f32 0.6931472, %v528_v25 }
  0x51   : > { %v282_v29 = vmul.f32 0.6931472, %v530_v27 }
  0x52   : > { %v283_v30 = vsub.f32 %v272_v24, %v280_v28 }
  0x53   : > { %v284_v31 = vsub.f32 %v274_v26, %v282_v29 }
  0x54   : > { %v285_v32 = vmul.f32 %v283_v30, %v283_v30 }
  0x55   : > { %v286_v33 = vmul.f32 %v284_v31, %v284_v31 }
  0x57   : > { %v287_v34 = vadd.f32 %v286_v33, %v285_v32 }
  0x59   : > { %290 = vst [vmem:[%s235_s6] sm:$0xff] %v287_v34 }
  0x5a   : > { %618 = shalt.err (!%p615_p7)
}
  0x5b   : > { %433 = dma.vmem_to_hbm [thread:$0]  (%p783_p12), %s305_s29, 128, %s307_s3, %s292_s7  }
  0x5c PF: > { %s318_s4 = sand.u32 1, %s670_s9   ;;  %p443_p9 = pnand %p411_p13, %p788_p0 }
  0x5d   : > { %s319_s21 = scalar_lea.sflag [#allocation4], %s318_s4 }
  0x5e   : > { %p444_p10 = pneg %p443_p9 }
  0x60   : > { %664 = dma.done.wait (%p444_p10), %s319_s21, 128  }
  0x61   : > { %666 = vsyncadd (%p444_p10), %s319_s21, 4294967168  ;;  %s21_s16 = sadd.s32 1, %s698_s16   ;;  %s897_s9 = smov %s674_s10 }
  0x62   : > { %p18_p3 = scmp.ge.s32.totalorder %s21_s16, 4   ;;  %s898_s10 = smov %s678_s11 }
  0x63   : > { %s899_s11 = smov %s777_s24  ;;  %s900_s12 = smov %s686_s13 }
  0x64   : > { %s878_s13 = smov 0   ;;  %s901_s14 = smov %s694_s15 }
  0x65   : > { %s902_s15 = smov %s904_s19  ;;  %20 = sbr.rel (!%p18_p3) target bundleno = 9 (0x9), region = 90 }
  0x6a   :  { %325 = vsyncpa [#allocation3], 1 }
  0x6b   :  { %327 = vsyncpa [#allocation3 + $0x1], 1 }
  0x6c   :  { %328 = vsyncpa [#allocation6], 1 }
  0x6d   :  { %330 = vsyncpa [#allocation6 + $0x1], 1 }
  0x6e   :  { %331 = vsyncpa [#allocation4], 1 }
  0x6f   :  { %333 = vsyncpa [#allocation4 + $0x1], 1 }

</bundles_post_ra>
